<compile_context>
chip_gen: v7x
topology: tpu7x:2x2x1
jax: 0.10.0
libtpu: 0.0.40
codegen_flags: <defaults>
</compile_context>

<pallas_src>
import jax
import jax.numpy as jnp
from jax.experimental import pallas as pl
from jax.experimental.pallas import tpu as pltpu


def _pick_hw_tile(hw, bytes_per_hw_unit, vmem_budget=8 * 1024 * 1024):
    """Largest lane-dense (multiple-of-128) tile dividing hw that fits budget.

    bytes_per_hw_unit already accounts for all blocks (in + out) including
    double buffering. Falls back to the full hw extent (always legal: block
    dim == full array dim)."""
    candidates = [t for t in (8192, 4096, 2048, 1024, 512, 256, 128)
                  if hw % t == 0]
    for t in candidates:
        if t * bytes_per_hw_unit <= vmem_budget:
            return t
    return candidates[-1] if candidates else hw


def _make_concat_kernel(C1, C2, k1, k2):
    """out = cat([x1, x2, x1[:, :k1], x2[:, :k2]], dim=1) on (1, C, thw) blocks."""
    def kernel(x1_ref, x2_ref, o_ref):
        v1 = x1_ref[...]                     # load once per block
        v2 = x2_ref[...]
        o_ref[:, 0:C1, :] = v1
        o_ref[:, C1:C1 + C2, :] = v2
        if k1 > 0:                           # tail: duplicated channels (vreg copy)
            o_ref[:, C1 + C2:C1 + C2 + k1, :] = v1[:, 0:k1, :]
        if k2 > 0:
            o_ref[:, C1 + C2 + k1:C1 + C2 + k1 + k2, :] = v2[:, 0:k2, :]
    return kernel


def model_forward(x1, x2):
    """Pallas implementation of Model.forward (NCHW in, NCHW out)."""
    N, C1, H, W = x1.shape
    N2, C2, H2, W2 = x2.shape
    assert (N, H, W) == (N2, H2, W2), "batch/spatial dims must match for channel concat"

    hw = H * W
    c_cat = C1 + C2                      # channels of v2
    c_slice = min(hw, c_cat)             # PyTorch slice clamps to bounds
    k1 = min(c_slice, C1)                # tail channels taken from x1
    k2 = c_slice - k1                    # tail channels taken from x2
    out_C = c_cat + c_slice

    # Lane-dense flatten: (N, C, H, W) -> (N, C, H*W). Row-major, no data copy.
    x1f = x1.reshape(N, C1, hw)
    x2f = x2.reshape(N, C2, hw)

    itemsize = jnp.dtype(x1.dtype).itemsize
    # bytes per unit of hw across all blocks, double-buffered.
    bytes_per_hw_unit = (C1 + C2 + out_C) * itemsize * 2
    thw = _pick_hw_tile(hw, bytes_per_hw_unit)
    grid = (N, hw // thw)

    kernel = _make_concat_kernel(C1, C2, k1, k2)

    out = pl.pallas_call(
        kernel,
        out_shape=jax.ShapeDtypeStruct((N, out_C, hw), x1.dtype),
        grid=grid,
        in_specs=[
            pl.BlockSpec((1, C1, thw), lambda n, j: (n, 0, j)),
            pl.BlockSpec((1, C2, thw), lambda n, j: (n, 0, j)),
        ],
        out_specs=pl.BlockSpec((1, out_C, thw), lambda n, j: (n, 0, j)),
        compiler_params=pltpu.CompilerParams(
            dimension_semantics=("parallel", "parallel"),
            vmem_limit_bytes=32 * 1024 * 1024,
        ),
    )(x1f, x2f)

    return out.reshape(N, out_C, H, W)


def model_forward_ref(x1, x2):
    """Pure-JAX reference matching the PyTorch module exactly."""
    H, W = x1.shape[2], x1.shape[3]
    x1_size_2 = H * W
    v2 = jnp.concatenate([x1, x2], axis=1)
    v3_1 = v2[:, 0:9223372036854775807]
    v3_2 = v3_1[:, 0:min(x1_size_2, v3_1.shape[1])]
    v4 = jnp.concatenate([v2, v3_2], axis=1)
    return v4


if __name__ == "__main__":
    key = jax.random.PRNGKey(0)
    k1, k2 = jax.random.split(key)
    # Small shapes consistent with the module: N=2, C=3, H=W=16 (H*W=256, lane-dense).
    x1 = jax.random.normal(k1, (2, 3, 16, 16), dtype=jnp.float32)
    x2 = jax.random.normal(k2, (2, 3, 16, 16), dtype=jnp.float32)

    out = model_forward(x1, x2)
    out = jax.block_until_ready(out)

    ref = model_forward_ref(x1, x2)
    assert out.shape == ref.shape, (out.shape, ref.shape)
    assert jnp.allclose(out, ref), "mismatch vs reference"

    print("KERNEL_OK")
</pallas_src>

<mosaic_0001>
module attributes {stable_mosaic.version = 11 : i64} {
  func.func @kernel(%arg0: i32, %arg1: i32, %arg2: memref<1x3x256xf32, #tpu.memory_space<vmem>>, %arg3: memref<1x3x256xf32, #tpu.memory_space<vmem>>, %arg4: memref<1x12x256xf32, #tpu.memory_space<vmem>>) attributes {dimension_semantics = [#tpu.dimension_semantics<parallel>, #tpu.dimension_semantics<parallel>], iteration_bounds = array<i64: 2, 1>, scalar_prefetch = 0 : i64, scratch_operands = 0 : i64, tpu.core_type = #tpu.core_type<tc>, window_params = [{transform_indices = @transform_0, window_bounds = array<i64: 1, 3, 256>}, {transform_indices = @transform_1, window_bounds = array<i64: 1, 3, 256>}, {transform_indices = @transform_2, window_bounds = array<i64: 1, 12, 256>}]} {
    %c0 = arith.constant 0 : index
    %c0_0 = arith.constant 0 : index
    %c0_1 = arith.constant 0 : index
    %0 = vector.load %arg2[%c0, %c0_0, %c0_1] : memref<1x3x256xf32, #tpu.memory_space<vmem>>, vector<1x3x256xf32>
    %c0_2 = arith.constant 0 : index
    %c0_3 = arith.constant 0 : index
    %c0_4 = arith.constant 0 : index
    %1 = vector.load %arg3[%c0_2, %c0_3, %c0_4] : memref<1x3x256xf32, #tpu.memory_space<vmem>>, vector<1x3x256xf32>
    %c0_5 = arith.constant 0 : index
    %c0_6 = arith.constant 0 : index
    %c0_7 = arith.constant 0 : index
    %2 = vector.load %arg4[%c0_5, %c0_6, %c0_7] : memref<1x12x256xf32, #tpu.memory_space<vmem>>, vector<1x3x256xf32>
    tpu.vector_store %arg4[%c0_5, %c0_6, %c0_7], %0 {strides = array<i32>} : memref<1x12x256xf32, #tpu.memory_space<vmem>>, vector<1x3x256xf32>,
    %c0_8 = arith.constant 0 : index
    %c3 = arith.constant 3 : index
    %c0_9 = arith.constant 0 : index
    %3 = vector.load %arg4[%c0_8, %c3, %c0_9] : memref<1x12x256xf32, #tpu.memory_space<vmem>>, vector<1x3x256xf32>
    tpu.vector_store %arg4[%c0_8, %c3, %c0_9], %1 {strides = array<i32>} : memref<1x12x256xf32, #tpu.memory_space<vmem>>, vector<1x3x256xf32>,
    %c0_10 = arith.constant 0 : index
    %c6 = arith.constant 6 : index
    %c0_11 = arith.constant 0 : index
    %4 = vector.load %arg4[%c0_10, %c6, %c0_11] : memref<1x12x256xf32, #tpu.memory_space<vmem>>, vector<1x3x256xf32>
    tpu.vector_store %arg4[%c0_10, %c6, %c0_11], %0 {strides = array<i32>} : memref<1x12x256xf32, #tpu.memory_space<vmem>>, vector<1x3x256xf32>,
    %c0_12 = arith.constant 0 : index
    %c9 = arith.constant 9 : index
    %c0_13 = arith.constant 0 : index
    %5 = vector.load %arg4[%c0_12, %c9, %c0_13] : memref<1x12x256xf32, #tpu.memory_space<vmem>>, vector<1x3x256xf32>
    tpu.vector_store %arg4[%c0_12, %c9, %c0_13], %1 {strides = array<i32>} : memref<1x12x256xf32, #tpu.memory_space<vmem>>, vector<1x3x256xf32>,
    return
  }
  func.func @transform_0(%arg0: i32, %arg1: i32) -> (i32, i32, i32) {
    %c0_i32 = arith.constant 0 : i32
    %c0_i32_0 = arith.constant 0 : i32
    return %arg0, %c0_i32, %arg1 : i32, i32, i32
  }
  func.func @transform_1(%arg0: i32, %arg1: i32) -> (i32, i32, i32) {
    %c0_i32 = arith.constant 0 : i32
    %c0_i32_0 = arith.constant 0 : i32
    return %arg0, %c0_i32, %arg1 : i32, i32, i32
  }
  func.func @transform_2(%arg0: i32, %arg1: i32) -> (i32, i32, i32) {
    %c0_i32 = arith.constant 0 : i32
    %c0_i32_0 = arith.constant 0 : i32
    return %arg0, %c0_i32, %arg1 : i32, i32, i32
  }
}

</mosaic_0001>

<bundles_post_ra>
// kernel: tpu_custom_call.1
= control target key start
LH: loop header
LB: loop body
LE: loop exit
PB: predicated region body
PF: predicated region fallthrough
CT: control target
= control target key end

     0   :  { %s434_s9 = smov 0   ;;  %s436_s10 = smov 0   ;;  %s470_s0 = inlined_call_operand.vmem [shape: f32[2,3,256], index: 0, kind: input, shape index: {}]   ;;  %s471_s1 = inlined_call_operand.vmem [shape: f32[2,3,256], index: 1, kind: input, shape index: {}]   ;;  %s472_s2 = inlined_call_operand.vmem [shape: f32[2,12,256], index: 2, kind: output, shape index: {}]  }
   0x1   :  { %s438_s11 = smov 0  }
   0x2 LB: > { %s24_s12 = sadd.s32 1, %s413_s10  ;;  %p357_p0 = scmp.ge.s32.totalorder %s417_s11, 1  ;;  %s417_s11 = sphi %s438_s11, %s12_s11   ;;  %s413_s10 = sphi %s436_s10, %s474_s10   ;;  %s409_s9 = sphi %s434_s9, %s473_s9  }
   0x3   : > { %p26_p1 = scmp.ge.s32.totalorder %s24_s12, 2  ;;  %p150_p2 = scmp.lt.s32.totalorder %s417_s11, 3 }
   0x5   : > { %s476_s12 = smov (%p26_p1, %s24_s12), 0  ;;  %p151_p3 = pnand %p357_p0, %p150_p2 }
   0x6   : > { %p190_p4 = scmp.lt.s32.totalorder (!%p151_p3), %s409_s9, 1 }
   0x7   : > { %154 = sbr.rel (%p151_p3) target bundleno = 24 (0x18), region = 28 }
   0xe   : > { %s478_s9 = smov (!%p190_p4, %s409_s9), 1 }
   0xf   : > { %s366_s13 = sshll.u32 %s478_s9, 3  ;;  %s368_s14 = sshll.u32 %s478_s9, 5 }
  0x10   : > { %s197_s17 = scalar_lea.vmem %s470_s0, %s366_s13  ;;  %s217_s20 = scalar_lea.vmem %s472_s2, %s368_s14 }
  0x11   : > { %v219_v0 = vld [vmem:[%s197_s17] sm:$0x77]  ;;  %s207_s23 = scalar_lea.vmem %s471_s1, %s366_s13 }
  0x12   : > { %224 = vst [vmem:[%s217_s20] sm:$0x7] %v219_v0  ;;  %v222_v1 = vcombine.high %v219_v0, %v219_v0  ;;  %v220_v2 = vld [vmem:[%s207_s23] sm:$0x77]  ;;  %v234_v3 = vrot.slane %v219_v0, 2 }
  0x13   : > { %v228_v4 = vrot.slane %v220_v2, 5  ;;  %v227_v5 = vcombine.high %v220_v2, %v220_v2  ;;  %v242_v6 = vrot.slane %v220_v2, 7 }
  0x14   : > { %225 = vst [vmem:[%s217_s20 + $0x8] sm:$0x7] %v222_v1  ;;  %238 = vst [vmem:[%s217_s20 + $0x10] ss:$-12 sps:$4 sm:$0xc1] %v234_v3   ;;  %v235_v7 = vrot.slane %v222_v1, 2 }
  0x15   : > { %232 = vst [vmem:[%s217_s20] sm:$0x38] %v228_v4  ;;  %v229_v8 = vrot.slane %v227_v5, 5  ;;  %246 = vst [vmem:[%s217_s20 + $0x10] sm:$0xe] %v242_v6  ;;  %v243_v9 = vrot.slane %v227_v5, 7 }
  0x16   : > { %239 = vst [vmem:[%s217_s20 + $0x18] ss:$-12 sps:$4 sm:$0xc1] %v235_v7  }
  0x17   : > { %233 = vst [vmem:[%s217_s20 + $0x8] sm:$0x38] %v229_v8  ;;  %247 = vst [vmem:[%s217_s20 + $0x18] sm:$0xe] %v243_v9 }
  0x18 PF: > { %s12_s11 = sadd.s32 1, %s417_s11   ;;  %s473_s9 = smov %s413_s10 }
  0x19   : > { %p9_p5 = scmp.ge.s32.totalorder %s12_s11, 4   ;;  %s474_s10 = smov %s476_s12 }
  0x1b   :  { %11 = sbr.rel (!%p9_p5) target bundleno = 2 (0x2), region = 61 }

</bundles_post_ra>
